<compile_context>
chip_gen: v6e
topology: v6e:2x2x1
jax: 0.10.0
libtpu: 0.0.40
codegen_flags: <defaults>
</compile_context>

<pallas_src>
import jax
import jax.numpy as jnp
from jax.experimental import pallas as pl
from jax.experimental.pallas import tpu as pltpu

NODE = 128          # hidden width ("node" in the torch code)
INPUT_DIM = 4
OUTPUT_DIM = 128


def mlp_kernel(x_ref, w1_ref, b1_ref, w2_ref, b2_ref, w3_ref, b3_ref, o_ref):
    """Fused 3-layer MLP with ReLU; all tiles resident in VMEM."""
    x = x_ref[...]            # (tile_b, 4)   f32
    w1 = w1_ref[...]          # (4, NODE)     f32
    w2 = w2_ref[...]          # (NODE, NODE)  bf16 (or f32)
    w3 = w3_ref[...]          # (NODE, NODE)  bf16 (or f32)

    # ---- Layer 1: K=4 contraction done on the VPU as 4 broadcast-FMAs.
    # Avoids an MXU pass whose contraction depth would be padded 4 -> 128/256
    # and the sub-(8,128) lhs layout shuffle. VPU has ample slack here.
    h1 = b1_ref[...]                                   # (1, NODE), broadcasts up
    for k in range(INPUT_DIM):                         # static unroll, 4 FMAs
        h1 = h1 + x[:, k:k + 1] * w1[k:k + 1, :]       # (tile_b,1)*(1,NODE)
    h1 = jnp.maximum(h1, 0.0)                          # (tile_b, NODE) f32

    # ---- Layer 2: MXU matmul, bf16 operands, f32 accumulate.
    h2 = jnp.dot(h1.astype(w2.dtype), w2,
                 preferred_element_type=jnp.float32) + b2_ref[...]
    h2 = jnp.maximum(h2, 0.0)

    # ---- Layer 3: MXU matmul, bf16 operands, f32 accumulate.
    h3 = jnp.dot(h2.astype(w3.dtype), w3,
                 preferred_element_type=jnp.float32) + b3_ref[...]
    o_ref[...] = jnp.maximum(h3, 0.0)                  # f32, lane-dense store


def _choose_tile_b(B):
    """Pick a batch tile: whole batch when small; MXU-aligned tiles with >=2
    grid steps when large (so v7x's two TensorCores both get work)."""
    if B <= 512:
        return B
    for t in (2048, 1024, 512, 256, 128, 64, 32, 16, 8):
        if B % t == 0 and B // t >= 2:
            return t
    return B  # odd batch size: fall back to a single resident block


def pos_feature_extractor(x, params, *, tile_b=None, weights_bf16=True):
    """x: [B, INPUT_DIM] float32. Returns [B, OUTPUT_DIM] float32."""
    w1, b1, w2, b2, w3, b3 = params
    B, F = x.shape
    assert F == INPUT_DIM

    if tile_b is None:
        tile_b = _choose_tile_b(B)
    assert B % tile_b == 0, "batch must be a multiple of tile_b (pad caller-side)"
    assert tile_b == B or tile_b % 8 == 0, "partial tiles must be 8-row aligned"

    if weights_bf16:
        # MXU-bound layers run ~2x faster with bf16 operands; accumulation
        # stays f32 via preferred_element_type. Layer-1 path stays f32 (VPU).
        w2 = w2.astype(jnp.bfloat16)
        w3 = w3.astype(jnp.bfloat16)

    grid = (B // tile_b,)
    const = lambda i: (0, 0)   # weights/biases: same block every grid step

    return pl.pallas_call(
        mlp_kernel,
        out_shape=jax.ShapeDtypeStruct((B, OUTPUT_DIM), jnp.float32),
        grid_spec=pltpu.PrefetchScalarGridSpec(
            num_scalar_prefetch=0,
            grid=grid,
            in_specs=[
                pl.BlockSpec((tile_b, INPUT_DIM), lambda i: (i, 0)),  # x tile
                pl.BlockSpec((INPUT_DIM, NODE), const),               # W1
                pl.BlockSpec((1, NODE), const),                       # b1
                pl.BlockSpec((NODE, NODE), const),                    # W2
                pl.BlockSpec((1, NODE), const),                       # b2
                pl.BlockSpec((NODE, OUTPUT_DIM), const),              # W3
                pl.BlockSpec((1, OUTPUT_DIM), const),                 # b3
            ],
            out_specs=pl.BlockSpec((tile_b, OUTPUT_DIM), lambda i: (i, 0)),
        ),
        compiler_params=pltpu.CompilerParams(
            dimension_semantics=("parallel",)
        ),
    )(x, w1, b1, w2, b2, w3, b3)


def init_params(key):
    """Deterministic synthetic parameters (same shapes as NN_beam_pred), f32."""
    k1, k2, k3, k4, k5, k6 = jax.random.split(key, 6)
    # Stored as [in, out] (transpose of torch Linear weight [out, in]).
    w1 = jax.random.normal(k1, (INPUT_DIM, NODE), jnp.float32) * 0.1
    b1 = jax.random.normal(k2, (1, NODE), jnp.float32) * 0.1
    w2 = jax.random.normal(k3, (NODE, NODE), jnp.float32) * 0.1
    b2 = jax.random.normal(k4, (1, NODE), jnp.float32) * 0.1
    w3 = jax.random.normal(k5, (NODE, OUTPUT_DIM), jnp.float32) * 0.1
    b3 = jax.random.normal(k6, (1, OUTPUT_DIM), jnp.float32) * 0.1
    return (w1, b1, w2, b2, w3, b3)


def reference_forward(x, params):
    """Pure-JAX f32 reference mirroring the PyTorch forward exactly."""
    w1, b1, w2, b2, w3, b3 = params
    h = jnp.maximum(x @ w1 + b1, 0.0)
    h = jnp.maximum(h @ w2 + b2, 0.0)
    h = jnp.maximum(h @ w3 + b3, 0.0)
    return h


if __name__ == "__main__":
    key = jax.random.PRNGKey(0)
    kx, kb, kp = jax.random.split(key, 3)
    params = init_params(kp)

    # --- Small batch: single grid step, everything resident (tile_b = B).
    B = 16
    x = jax.random.normal(kx, (B, INPUT_DIM), jnp.float32)
    out = jax.block_until_ready(pos_feature_extractor(x, params))
    ref = reference_forward(x, params)
    assert out.shape == (B, OUTPUT_DIM)
    assert jnp.allclose(out, ref, atol=2e-2, rtol=2e-2), "bf16 path mismatch"

    # Exact-precision check: full f32 path must match tightly.
    out_f32 = jax.block_until_ready(
        pos_feature_extractor(x, params, weights_bf16=False))
    assert jnp.allclose(out_f32, ref, atol=1e-5, rtol=1e-5), "f32 path mismatch"

    # --- Larger batch: exercises the multi-step grid (auto tile_b=512 -> 2 steps,
    # sharded across both TensorCores on v7x via "parallel").
    B_big = 1024
    x_big = jax.random.normal(kb, (B_big, INPUT_DIM), jnp.float32)
    out_big = jax.block_until_ready(pos_feature_extractor(x_big, params))
    ref_big = reference_forward(x_big, params)
    assert out_big.shape == (B_big, OUTPUT_DIM)
    assert jnp.allclose(out_big, ref_big, atol=2e-2, rtol=2e-2), "tiled mismatch"

    print("KERNEL_OK")
</pallas_src>

<mosaic_0001>
module attributes {stable_mosaic.version = 11 : i64} {
  func.func @mlp_kernel(%arg0: i32, %arg1: memref<16x4xf32, #tpu.memory_space<vmem>>, %arg2: memref<4x128xf32, #tpu.memory_space<vmem>>, %arg3: memref<1x128xf32, #tpu.memory_space<vmem>>, %arg4: memref<128x128xbf16, #tpu.memory_space<vmem>>, %arg5: memref<1x128xf32, #tpu.memory_space<vmem>>, %arg6: memref<128x128xbf16, #tpu.memory_space<vmem>>, %arg7: memref<1x128xf32, #tpu.memory_space<vmem>>, %arg8: memref<16x128xf32, #tpu.memory_space<vmem>>) attributes {dimension_semantics = [#tpu.dimension_semantics<parallel>], iteration_bounds = array<i64: 1>, scalar_prefetch = 0 : i64, scratch_operands = 0 : i64, tpu.core_type = #tpu.core_type<tc>, window_params = [{transform_indices = @transform_0, window_bounds = array<i64: 16, 4>}, {pipeline_mode = #tpu.pipeline_mode<synchronous>, transform_indices = @transform_1, window_bounds = array<i64: 4, 128>}, {pipeline_mode = #tpu.pipeline_mode<synchronous>, transform_indices = @transform_2, window_bounds = array<i64: 1, 128>}, {pipeline_mode = #tpu.pipeline_mode<synchronous>, transform_indices = @transform_3, window_bounds = array<i64: 128, 128>}, {pipeline_mode = #tpu.pipeline_mode<synchronous>, transform_indices = @transform_4, window_bounds = array<i64: 1, 128>}, {pipeline_mode = #tpu.pipeline_mode<synchronous>, transform_indices = @transform_5, window_bounds = array<i64: 128, 128>}, {pipeline_mode = #tpu.pipeline_mode<synchronous>, transform_indices = @transform_6, window_bounds = array<i64: 1, 128>}, {transform_indices = @transform_7, window_bounds = array<i64: 16, 128>}]} {
    %c0 = arith.constant 0 : index
    %c0_0 = arith.constant 0 : index
    %0 = vector.load %arg1[%c0, %c0_0] : memref<16x4xf32, #tpu.memory_space<vmem>>, vector<16x4xf32>
    %c0_1 = arith.constant 0 : index
    %c0_2 = arith.constant 0 : index
    %1 = vector.load %arg2[%c0_1, %c0_2] : memref<4x128xf32, #tpu.memory_space<vmem>>, vector<4x128xf32>
    %c0_3 = arith.constant 0 : index
    %c0_4 = arith.constant 0 : index
    %2 = vector.load %arg4[%c0_3, %c0_4] : memref<128x128xbf16, #tpu.memory_space<vmem>>, vector<128x128xbf16>
    %c0_5 = arith.constant 0 : index
    %c0_6 = arith.constant 0 : index
    %3 = vector.load %arg6[%c0_5, %c0_6] : memref<128x128xbf16, #tpu.memory_space<vmem>>, vector<128x128xbf16>
    %c0_7 = arith.constant 0 : index
    %c0_8 = arith.constant 0 : index
    %4 = vector.load %arg3[%c0_7, %c0_8] : memref<1x128xf32, #tpu.memory_space<vmem>>, vector<1x128xf32>
    %5 = vector.extract_strided_slice %0 {offsets = [0, 0], sizes = [16, 1], strides = [1, 1]} : vector<16x4xf32> to vector<16x1xf32>
    %6 = vector.extract_strided_slice %1 {offsets = [0, 0], sizes = [1, 128], strides = [1, 1]} : vector<4x128xf32> to vector<1x128xf32>
    %7 = vector.broadcast %5 : vector<16x1xf32> to vector<16x128xf32>
    %8 = vector.broadcast %6 : vector<1x128xf32> to vector<16x128xf32>
    %9 = arith.mulf %7, %8 : vector<16x128xf32>
    %10 = vector.broadcast %4 : vector<1x128xf32> to vector<16x128xf32>
    %11 = arith.addf %10, %9 : vector<16x128xf32>
    %12 = vector.extract_strided_slice %0 {offsets = [0, 1], sizes = [16, 1], strides = [1, 1]} : vector<16x4xf32> to vector<16x1xf32>
    %13 = vector.extract_strided_slice %1 {offsets = [1, 0], sizes = [1, 128], strides = [1, 1]} : vector<4x128xf32> to vector<1x128xf32>
    %14 = vector.broadcast %12 : vector<16x1xf32> to vector<16x128xf32>
    %15 = vector.broadcast %13 : vector<1x128xf32> to vector<16x128xf32>
    %16 = arith.mulf %14, %15 : vector<16x128xf32>
    %17 = arith.addf %11, %16 : vector<16x128xf32>
    %18 = vector.extract_strided_slice %0 {offsets = [0, 2], sizes = [16, 1], strides = [1, 1]} : vector<16x4xf32> to vector<16x1xf32>
    %19 = vector.extract_strided_slice %1 {offsets = [2, 0], sizes = [1, 128], strides = [1, 1]} : vector<4x128xf32> to vector<1x128xf32>
    %20 = vector.broadcast %18 : vector<16x1xf32> to vector<16x128xf32>
    %21 = vector.broadcast %19 : vector<1x128xf32> to vector<16x128xf32>
    %22 = arith.mulf %20, %21 : vector<16x128xf32>
    %23 = arith.addf %17, %22 : vector<16x128xf32>
    %24 = vector.extract_strided_slice %0 {offsets = [0, 3], sizes = [16, 1], strides = [1, 1]} : vector<16x4xf32> to vector<16x1xf32>
    %25 = vector.extract_strided_slice %1 {offsets = [3, 0], sizes = [1, 128], strides = [1, 1]} : vector<4x128xf32> to vector<1x128xf32>
    %26 = vector.broadcast %24 : vector<16x1xf32> to vector<16x128xf32>
    %27 = vector.broadcast %25 : vector<1x128xf32> to vector<16x128xf32>
    %28 = arith.mulf %26, %27 : vector<16x128xf32>
    %29 = arith.addf %23, %28 : vector<16x128xf32>
    %cst = arith.constant 0.000000e+00 : f32
    %30 = vector.broadcast %cst : f32 to vector<16x128xf32>
    %31 = arith.maximumf %29, %30 : vector<16x128xf32>
    %32 = arith.truncf %31 : vector<16x128xf32> to vector<16x128xbf16>
    %cst_9 = arith.constant dense<0.000000e+00> : vector<16x128xf32>
    %33 = tpu.matmul %32, %2, %cst_9 {dimension_numbers = #tpu.dot_dimension_numbers<[1], [0], [0], [1], [0, 0, 1, 1], [], []>} : vector<16x128xbf16>, vector<128x128xbf16>, vector<16x128xf32> -> vector<16x128xf32>
    %c0_10 = arith.constant 0 : index
    %c0_11 = arith.constant 0 : index
    %34 = vector.load %arg5[%c0_10, %c0_11] : memref<1x128xf32, #tpu.memory_space<vmem>>, vector<1x128xf32>
    %35 = vector.broadcast %34 : vector<1x128xf32> to vector<16x128xf32>
    %36 = arith.addf %33, %35 : vector<16x128xf32>
    %cst_12 = arith.constant 0.000000e+00 : f32
    %37 = vector.broadcast %cst_12 : f32 to vector<16x128xf32>
    %38 = arith.maximumf %36, %37 : vector<16x128xf32>
    %39 = arith.truncf %38 : vector<16x128xf32> to vector<16x128xbf16>
    %cst_13 = arith.constant dense<0.000000e+00> : vector<16x128xf32>
    %40 = tpu.matmul %39, %3, %cst_13 {dimension_numbers = #tpu.dot_dimension_numbers<[1], [0], [0], [1], [0, 0, 1, 1], [], []>} : vector<16x128xbf16>, vector<128x128xbf16>, vector<16x128xf32> -> vector<16x128xf32>
    %c0_14 = arith.constant 0 : index
    %c0_15 = arith.constant 0 : index
    %41 = vector.load %arg7[%c0_14, %c0_15] : memref<1x128xf32, #tpu.memory_space<vmem>>, vector<1x128xf32>
    %42 = vector.broadcast %41 : vector<1x128xf32> to vector<16x128xf32>
    %43 = arith.addf %40, %42 : vector<16x128xf32>
    %cst_16 = arith.constant 0.000000e+00 : f32
    %44 = vector.broadcast %cst_16 : f32 to vector<16x128xf32>
    %45 = arith.maximumf %43, %44 : vector<16x128xf32>
    %c0_17 = arith.constant 0 : index
    %c0_18 = arith.constant 0 : index
    %46 = vector.load %arg8[%c0_17, %c0_18] : memref<16x128xf32, #tpu.memory_space<vmem>>, vector<16x128xf32>
    tpu.vector_store %arg8[%c0_17, %c0_18], %45 {strides = array<i32>} : memref<16x128xf32, #tpu.memory_space<vmem>>, vector<16x128xf32>,
    return
  }
  func.func @transform_0(%arg0: i32) -> (i32, i32) {
    %c0_i32 = arith.constant 0 : i32
    %c0_i32_0 = arith.constant 0 : i32
    return %arg0, %c0_i32 : i32, i32
  }
  func.func @transform_1(%arg0: i32) -> (i32, i32) {
    %c0_i32 = arith.constant 0 : i32
    %c0_i32_0 = arith.constant 0 : i32
    %c0_i32_1 = arith.constant 0 : i32
    return %c0_i32, %c0_i32_0 : i32, i32
  }
  func.func @transform_2(%arg0: i32) -> (i32, i32) {
    %c0_i32 = arith.constant 0 : i32
    %c0_i32_0 = arith.constant 0 : i32
    %c0_i32_1 = arith.constant 0 : i32
    return %c0_i32, %c0_i32_0 : i32, i32
  }
  func.func @transform_3(%arg0: i32) -> (i32, i32) {
    %c0_i32 = arith.constant 0 : i32
    %c0_i32_0 = arith.constant 0 : i32
    %c0_i32_1 = arith.constant 0 : i32
    return %c0_i32, %c0_i32_0 : i32, i32
  }
  func.func @transform_4(%arg0: i32) -> (i32, i32) {
    %c0_i32 = arith.constant 0 : i32
    %c0_i32_0 = arith.constant 0 : i32
    %c0_i32_1 = arith.constant 0 : i32
    return %c0_i32, %c0_i32_0 : i32, i32
  }
  func.func @transform_5(%arg0: i32) -> (i32, i32) {
    %c0_i32 = arith.constant 0 : i32
    %c0_i32_0 = arith.constant 0 : i32
    %c0_i32_1 = arith.constant 0 : i32
    return %c0_i32, %c0_i32_0 : i32, i32
  }
  func.func @transform_6(%arg0: i32) -> (i32, i32) {
    %c0_i32 = arith.constant 0 : i32
    %c0_i32_0 = arith.constant 0 : i32
    %c0_i32_1 = arith.constant 0 : i32
    return %c0_i32, %c0_i32_0 : i32, i32
  }
  func.func @transform_7(%arg0: i32) -> (i32, i32) {
    %c0_i32 = arith.constant 0 : i32
    %c0_i32_0 = arith.constant 0 : i32
    return %arg0, %c0_i32 : i32, i32
  }
}

</mosaic_0001>

<bundles_post_ra>
// kernel: tpu_custom_call.1
= control target key start
LH: loop header
LB: loop body
LE: loop exit
PB: predicated region body
PF: predicated region fallthrough
CT: control target
= control target key end

     0   :  { %12 = vsyncpa [#allocation3], 0  ;;  %s660_s0 = inlined_call_operand.vmem [shape: f32[16,4], index: 0, kind: input, shape index: {}]   ;;  %s661_s1 = inlined_call_operand.vmem [shape: f32[4,128], index: 1, kind: input, shape index: {}]   ;;  %s662_s2 = inlined_call_operand.vmem [shape: f32[1,128], index: 2, kind: input, shape index: {}]   ;;  %s663_s3 = inlined_call_operand.hbm [shape: bf16[128,128], index: 3, kind: input, shape index: {}]   ;;  %s664_s4 = inlined_call_operand.vmem [shape: f32[1,128], index: 4, kind: input, shape index: {}]   ;;  %s665_s5 = inlined_call_operand.hbm [shape: bf16[128,128], index: 5, kind: input, shape index: {}]   ;;  %s666_s6 = inlined_call_operand.vmem [shape: f32[1,128], index: 6, kind: input, shape index: {}]   ;;  %s667_s7 = inlined_call_operand.hbm [shape: f32[16,128], index: 7, kind: output, shape index: {}]  }
   0x1   :  { %13 = vsyncpa [#allocation6], 0 }
   0x2   :  { %14 = vsyncpa [#allocation4], 0  ;;  %s562_s24 = smov [#allocation2]  }
   0x3   :  { %s26_s25 = sshll.u32 %s562_s24, 4  ;;  %s27_s25 = int_to_ptr.vmem [resolvable:$true] %s26_s25 }
   0x4   :  { %s504_s26 = scalar_lea.vmem %s27_s25, 1024  ;;  %p509_p1 = scmp.lt.s32.totalorder %s27_s25, %s27_s25 }
   0x5   :  { %p505_p0 = scmp.ne.s32.totalorder %s27_s25, %s504_s26  ;;  %p510_p2 = scmp.lt.s32.totalorder %s504_s26, %s504_s26 }
   0x7   :  { %p511_p3 = por %p510_p2, %p509_p1 }
   0x9   :  { %p512_p4 = pnand %p511_p3, %p505_p0 }
   0xb   :  { %515 = shalt.err (!%p512_p4)
}
   0xc   :  { %s563_s27 = smov 64   ;;  %s564_s28 = smov 4  }
   0xd   :  { %32 = dma.hbm_to_vmem [thread:$0]  %s663_s3, 1024, %s27_s25, [#allocation3], %s563_s27, %s563_s27, %s564_s28  }
   0xe   :  { %s565_s8 = smov [#allocation5]  }
   0xf   :  { %s40_s9 = sshll.u32 %s565_s8, 4  ;;  %s41_s9 = int_to_ptr.vmem [resolvable:$true] %s40_s9 }
  0x10   :  { %s524_s10 = scalar_lea.vmem %s41_s9, 1024  ;;  %p529_p6 = scmp.lt.s32.totalorder %s41_s9, %s41_s9 }
  0x11   :  { %p525_p5 = scmp.ne.s32.totalorder %s41_s9, %s524_s10  ;;  %p530_p7 = scmp.lt.s32.totalorder %s524_s10, %s524_s10 }
  0x13   :  { %p531_p8 = por %p530_p7, %p529_p6 }
  0x15   :  { %p532_p9 = pnand %p531_p8, %p525_p5 }
  0x17   :  { %535 = shalt.err (!%p532_p9)
}
  0x18   :  { %46 = dma.hbm_to_vmem [thread:$0]  %s665_s5, 1024, %s41_s9, [#allocation6], %s563_s27, %s563_s27, %s564_s28  }
  0x19   :  { %556 = dma.done.wait [#allocation3], 1024  }
  0x1a   :  { %557 = vsyncadd [#allocation3], 4294966272 }
  0x1b   :  { %558 = dma.done.wait [#allocation6], 1024  }
  0x1c   :  { %559 = vsyncadd [#allocation6], 4294966272  ;;  %v566_v0 = vmov 1   ;;  %v567_v1 = vmov 0   ;;  %v568_v2 = vmov 0.0   ;;  %v56_v3 = vld [vmem:[%s660_s0] sm:$0xff]  ;;  %v102_v20 = vlaneseq }
  0x1d   :  { %475 = vset.pattern.permute.xlu1 %v566_v0  ;;  %474 = vset.pattern.permute.xlu0 %v567_v1  ;;  %v480_v4 = vld [vmem:[#allocation2 + $0x38] sm:$0xff]   ;;  %v57_v5 = vld [vmem:[%s660_s0 + $0x8] sm:$0xff]  ;;  %v481_v6 = vld [vmem:[#allocation2 + $0x30] sm:$0xff]   ;;  %v569_v8 = vmov 2   ;;  %v570_v10 = vmov 3   ;;  %vm571_vm0 = vmmov 0  }
  0x1e   :  { %421 = vmatprep.subr.bf16.mxu0 %v568_v2  ;;  %441 = vmatprep.subr.bf16.mxu1 %v568_v2  ;;  %v482_v7 = vld [vmem:[#allocation2 + $0x28] sm:$0xff]   ;;  %v483_v9 = vld [vmem:[#allocation2 + $0x20] sm:$0xff]   ;;  %v484_v11 = vld [vmem:[#allocation2 + $0x18] sm:$0xff]   ;;  %v103_v21 = vshrl.u32 %v102_v20, 7  ;;  %s572_s20 = smov [#allocation7]  }
  0x1f   :  { %117 = vperm.xlu1 %475, %v56_v3   ;;  %94 = vperm.xlu0 %474, %v56_v3   ;;  %v488_v12 = vld [vmem:[#allocation5 + $0x38] sm:$0xff]   ;;  %v485_v13 = vld [vmem:[#allocation2 + $0x10] sm:$0xff]   ;;  %v486_v15 = vld [vmem:[#allocation2 + $0x8] sm:$0xff]  }
  0x20   :  { %422 = vmatpush3.bf16.msra.mxu0 %v480_v4  ;;  %437 = vmatprep.mubr.msk.bf16.mxu0 %vm571_vm0, %v568_v2  ;;  %v489_v14 = vld [vmem:[#allocation5 + $0x30] sm:$0xff]   ;;  %v490_v16 = vld [vmem:[#allocation5 + $0x28] sm:$0xff]   ;;  %v487_v17 = vld [vmem:[#allocation2] sm:$0xff]   ;;  %v104_v22 = vsub.s32 0, %v103_v21  ;;  %v126_v27 = vsub.s32 1, %v103_v21  ;;  %v142_v28 = vsub.s32 2, %v103_v21 }
  0x21   :  { %423 = vmatprep.subr.bf16.mxu0 %v568_v2  ;;  %457 = vmatprep.mubr.msk.bf16.mxu1 %vm571_vm0, %v568_v2  ;;  %v491_v18 = vld [vmem:[#allocation5 + $0x20] sm:$0xff]   ;;  %v492_v19 = vld [vmem:[#allocation5 + $0x18] sm:$0xff]   ;;  %v158_v34 = vsub.s32 3, %v103_v21  ;;  %v493_v59 = vld [vmem:[#allocation5 + $0x10] sm:$0xff]  }
  0x22   :  { %442 = vmatpush3.bf16.msra.mxu1 %v488_v12  ;;  %v58_v23 = vld [vmem:[%s661_s1] sm:$0xf]  ;;  %v494_v60 = vld [vmem:[#allocation5 + $0x8] sm:$0xff]  }
  0x23   :  { %121 = vperm.xlu1 %475, %v57_v5   ;;  %99 = vperm.xlu0 %474, %v57_v5   ;;  %v105_v26 = vrot.slane %v58_v23, %v104_v22  ;;  %v384_v33 = vld [vmem:[%s662_s2] ss:$0 sm:$0xff]  ;;  %v127_v35 = vrot.slane %v58_v23, %v126_v27  ;;  %v143_v37 = vrot.slane %v58_v23, %v142_v28 }
  0x24   :  { %424 = vmatpush3.bf16.msra.mxu0 %v481_v6  ;;  %443 = vmatprep.subr.bf16.mxu1 %v568_v2  ;;  %v159_v42 = vrot.slane %v58_v23, %v158_v34  ;;  %v495_v61 = vld [vmem:[#allocation5] sm:$0xff]  }
  0x25   :  { %425 = vmatprep.subr.bf16.mxu0 %v568_v2  ;;  %v385_v62 = vld [vmem:[%s664_s4] ss:$0 sm:$0xff]  ;;  %s371_s4 = sshll.u32 %s572_s20, 4  ;;  %s372_s4 = int_to_ptr.vmem [resolvable:$true] %s371_s4 }
  0x26   :  { %444 = vmatpush3.bf16.msra.mxu1 %v489_v14  ;;  %s536_s21 = scalar_lea.vmem %s372_s4, 256  ;;  %p541_p11 = scmp.lt.s32.totalorder %s372_s4, %s372_s4 }
  0x27   :  { %477 = vset.pattern.permute.xlu1 %v569_v8  ;;  %476 = vset.pattern.permute.xlu0 %v569_v8  ;;  %p537_p10 = scmp.ne.s32.totalorder %s372_s4, %s536_s21  ;;  %p542_p12 = scmp.lt.s32.totalorder %s536_s21, %s536_s21 }
  0x28   :  { %137 = vperm.xlu1 %477, %v57_v5   ;;  %133 = vperm.xlu0 %476, %v56_v3  }
  0x29   :  { %426 = vmatpush3.bf16.msra.mxu0 %v482_v7  ;;  %445 = vmatprep.subr.bf16.mxu1 %v568_v2  ;;  %p543_p13 = por %p542_p12, %p541_p11 }
  0x2a   :  { %427 = vmatprep.subr.bf16.mxu0 %v568_v2  ;;  %446 = vmatpush3.bf16.msra.mxu1 %v490_v16 }
  0x2b   :  { %447 = vmatprep.subr.bf16.mxu1 %v568_v2  ;;  %p544_p0 = pnand %p543_p13, %p537_p10 }
  0x2c   :  { %478 = vset.pattern.permute.xlu1 %v570_v10  ;;  %479 = vset.pattern.permute.xlu0 %v570_v10 }
  0x2d   :  { %149 = vperm.xlu1 %478, %v56_v3   ;;  %153 = vperm.xlu0 %479, %v57_v5  }
  0x2e   :  { %428 = vmatpush3.bf16.msra.mxu0 %v483_v9  ;;  %448 = vmatpush3.bf16.msra.mxu1 %v491_v18 }
  0x2f   :  { %429 = vmatprep.subr.bf16.mxu0 %v568_v2  ;;  %449 = vmatprep.subr.bf16.mxu1 %v568_v2 }
  0x32   :  { %430 = vmatpush3.bf16.msra.mxu0 %v484_v11  ;;  %450 = vmatpush3.bf16.msra.mxu1 %v492_v19 }
  0x33   :  { %431 = vmatprep.subr.bf16.mxu0 %v568_v2  ;;  %451 = vmatprep.subr.bf16.mxu1 %v568_v2 }
  0x36   :  { %432 = vmatpush3.bf16.msra.mxu0 %v485_v13  ;;  %452 = vmatpush3.bf16.msra.mxu1 %v493_v59 }
  0x37   :  { %433 = vmatprep.subr.bf16.mxu0 %v568_v2  ;;  %453 = vmatprep.subr.bf16.mxu1 %v568_v2 }
  0x3a   :  { %434 = vmatpush3.bf16.msra.mxu0 %v486_v15  ;;  %454 = vmatpush3.bf16.msra.mxu1 %v494_v60 }
  0x3b   :  { %435 = vmatprep.subr.bf16.mxu0 %v568_v2  ;;  %455 = vmatprep.subr.bf16.mxu1 %v568_v2  ;;  %v394_v2 = vld [vmem:[%s666_s6] ss:$0 sm:$0xff] }
  0x3e   :  { %436 = vmatpush3.bf16.msra.mxu0 %v487_v17  ;;  %456 = vmatpush3.bf16.msra.mxu1 %v495_v61 }
  0x9a   :  { %v118_v24 = vpop.permute.xlu1 %117  ;;  %v95_v25 = vpop.permute.xlu0 %94 }
  0x9b   :  { %v106_v31 = vmul.f32 %v105_v26, %v95_v25  ;;  %v128_v43 = vmul.f32 %v127_v35, %v118_v24 }
  0x9d   :  { %v114_v38 = vadd.f32 %v384_v33, %v106_v31 }
  0x9e   :  { %v122_v29 = vpop.permute.xlu1 %121  ;;  %v100_v30 = vpop.permute.xlu0 %99 }
  0x9f   :  { %v107_v32 = vmul.f32 %v105_v26, %v100_v30  ;;  %v129_v39 = vmul.f32 %v127_v35, %v122_v29  ;;  %v130_v47 = vadd.f32 %v128_v43, %v114_v38 }
  0xa1   :  { %v115_v36 = vadd.f32 %v384_v33, %v107_v32 }
  0xa3   :  { %v138_v40 = vpop.permute.xlu1 %137  ;;  %v134_v41 = vpop.permute.xlu0 %133  ;;  %v131_v44 = vadd.f32 %v129_v39, %v115_v36 }
  0xa4   :  { %v145_v45 = vmul.f32 %v143_v37, %v138_v40  ;;  %v144_v46 = vmul.f32 %v143_v37, %v134_v41 }
  0xa6   :  { %v147_v50 = vadd.f32 %v145_v45, %v131_v44  ;;  %v146_v51 = vadd.f32 %v144_v46, %v130_v47 }
  0xa8   :  { %v150_v48 = vpop.permute.xlu1 %149  ;;  %v154_v49 = vpop.permute.xlu0 %153 }
  0xa9   :  { %v160_v52 = vmul.f32 %v159_v42, %v150_v48  ;;  %v161_v53 = vmul.f32 %v159_v42, %v154_v49 }
  0xab   :  { %v162_v54 = vadd.f32 %v160_v52, %v146_v51  ;;  %v163_v55 = vadd.f32 %v161_v53, %v147_v50 }
  0xad   :  { %v164_v56 = vmax.f32 %v162_v54, 0.0  ;;  %v165_v57 = vmax.f32 %v163_v55, 0.0 }
  0xaf   :  { %v166_v58 = vpack.c.bf16 %v165_v57, %v164_v56 }
  0xb1   :  { %438 = vmatmul.mubr.bf16.vlgmr.msra.gmra.mxu0 %v166_v58 }
 0x171   :  { %v256_v63 = vpop.f32.mrf.mxu0 }
 0x172   :  { %v257_v1 = vadd.f32 %v385_v62, %v256_v63 }
 0x173   :  { %v439_v0 = vpop.f32.mrf.mxu0 }
 0x174   :  { %v263_v6 = vmax.f32 %v257_v1, 0.0 }
 0x175   :  { %v259_v3 = vpop.f32.mrf.mxu0 }
 0x176   :  { %v260_v4 = vadd.f32 %v385_v62, %v259_v3 }
 0x177   :  { %v440_v5 = vpop.f32.mrf.mxu0 }
 0x178   :  { %v264_v7 = vmax.f32 %v260_v4, 0.0 }
 0x17a   :  { %v265_v8 = vpack.c.bf16 %v264_v7, %v263_v6 }
 0x17c   :  { %458 = vmatmul.mubr.bf16.vlgmr.msra.gmra.mxu1 %v265_v8 }
 0x23c   :  { %v355_v9 = vpop.f32.mrf.mxu1 }
 0x23d   :  { %v356_v10 = vadd.f32 %v394_v2, %v355_v9 }
 0x23e   :  { %v459_v11 = vpop.f32.mrf.mxu1 }
 0x23f   :  { %v362_v12 = vmax.f32 %v356_v10, 0.0 }
 0x240   :  { %v358_v13 = vpop.f32.mrf.mxu1 }
 0x241   :  { %364 = vst [vmem:[#allocation7] sm:$0xff] %v362_v12  ;;  %v359_v14 = vadd.f32 %v394_v2, %v358_v13 }
 0x242   :  { %v460_v15 = vpop.f32.mrf.mxu1 }
 0x243   :  { %v363_v16 = vmax.f32 %v359_v14, 0.0 }
 0x245   :  { %365 = vst [vmem:[#allocation7 + $0x8] sm:$0xff] %v363_v16 }
 0x246   :  { %547 = shalt.err (!%p544_p0)
}
 0x247   :  { %s573_s6 = smov 128   ;;  %s574_s22 = smov 8  }
 0x248   :  { %377 = dma.vmem_to_hbm [thread:$0]  %s372_s4, 256, %s667_s7, [#allocation4], %s573_s6, %s573_s6, %s574_s22  }
 0x249   :  { %560 = dma.done.wait [#allocation4], 256  }
 0x24a   :  { %561 = vsyncadd [#allocation4], 4294967040 }
 0x24b   :  { %381 = vsyncpa [#allocation3], 1 }
 0x24c   :  { %382 = vsyncpa [#allocation6], 1 }
 0x24d   :  { %383 = vsyncpa [#allocation4], 1 }

</bundles_post_ra>
